<compile_context>
chip_gen: v6e
topology: v6e:2x2x1
jax: 0.10.0
libtpu: 0.0.40
codegen_flags: <defaults>
</compile_context>

<pallas_src>
import functools

import jax
import jax.numpy as jnp
from jax import lax
from jax.experimental import pallas as pl
from jax.experimental.pallas import tpu as pltpu

_MIB = 1024 * 1024


def _round_up(v, m):
    return ((v + m - 1) // m) * m


def _round_down(v, m):
    return (v // m) * m


def _sublane_multiple(dtype):
    # Sub-32-bit dtypes pack along sublanes: 8 rows fp32, 16 bf16, 32 int8.
    return max(8, 32 // jnp.dtype(dtype).itemsize)


def _chip_info():
    """(physical VMEM bytes, num TensorCores, device_kind) with safe fallbacks."""
    kind = ""
    try:
        kind = jax.devices()[0].device_kind.lower()
    except Exception:
        pass
    is_v7 = "v7" in kind
    vmem = None
    try:
        vmem = int(getattr(pltpu.get_tpu_info(), "vmem_capacity_bytes", 0))
    except Exception:
        vmem = None
    if not vmem or vmem <= 0:
        vmem = (64 if is_v7 else 128) * _MIB
    vmem = min(vmem, 128 * _MIB)
    num_cores = 2 if is_v7 else 1  # v7x: 2 TensorCores/chip; v5e/v6e: 1
    return vmem, num_cores, kind


def _budgets(vmem_cap):
    """(per-grid-step block budget, scoped vmem_limit_bytes)."""
    if vmem_cap >= 96 * _MIB:
        # v5e / v6e class: 128 MiB physical VMEM -> big tiles, generous limit.
        vmem_limit = min(96 * _MIB, (vmem_cap * 3) // 4)
    else:
        # v7x class: 64 MiB per TensorCore -> keep real headroom.
        vmem_limit = max(16 * _MIB, min(40 * _MIB, vmem_cap - 16 * _MIB))
    vmem_limit = min(vmem_limit, vmem_cap)
    # Budget covers 2x(in) + 2x(out) pipeline buffers plus fp32 temporaries.
    return vmem_limit // 2, vmem_limit


def _bytes_per_elem(itemsize):
    # 2x input double-buffer + 2x output double-buffer + ~2 fp32 temporaries.
    return 4 * itemsize + 8


def _pick_rows(nc, hw, itemsize, sublane, block_budget, num_cores):
    """Row-block size for the full-HW path; None if it can't fit VMEM."""
    bpe = _bytes_per_elem(itemsize)
    budget_rows = _round_down(block_budget // (hw * bpe), sublane)
    if budget_rows < sublane:
        return None  # even a minimal block blows the budget -> HW-tiled path
    if nc <= sublane:
        return nc  # single short block (block dim == full array dim is legal)
    # v7x: keep >=8 grid steps (>=4 per TensorCore) so both cores get work;
    # single-TC chips only keep ~3 steps for DMA/compute overlap.
    min_steps = 8 if num_cores >= 2 else 3
    target = max(sublane, _round_down(nc // min_steps, sublane))
    rows = min(budget_rows, target, _round_up(nc, sublane))
    if rows >= nc:
        rows = nc
    return rows


def _pick_hw_tiling(nc, hw, itemsize, sublane, block_budget, num_cores, hw_block=None):
    """(rows_per_block, hw_tile) for the HW-tiled path."""
    bpe = _bytes_per_elem(itemsize)
    rows = _round_up(min(nc, 64), sublane)
    if num_cores >= 2:
        rows = min(rows, max(sublane, _round_down(nc // (2 * num_cores), sublane)))
    if rows >= nc:
        rows = nc
    if hw_block is not None:
        hw_tile = max(128, _round_down(int(hw_block), 128))
    else:
        hw_tile = max(128, _round_down(block_budget // (max(rows, 1) * bpe), 128))
    hw_tile = min(hw_tile, _round_up(hw, 128))
    return rows, hw_tile


# ---------------------------------------------------------------------------
# Path A: whole spatial extent resident per block.
# ---------------------------------------------------------------------------
def _instance_norm_block_kernel(x_ref, o_ref, *, eps, inv_hw, f32_elemwise):
    x = x_ref[...]
    # fp32-accumulated mean, then two-pass centered variance (matches the
    # PyTorch reference and avoids E[x^2]-mean^2 cancellation).
    mean = jnp.sum(x, axis=-1, keepdims=True, dtype=jnp.float32) * inv_hw
    if f32_elemwise:
        xc = x.astype(jnp.float32) - mean
        var = jnp.sum(xc * xc, axis=-1, keepdims=True) * inv_hw
        y = xc * lax.rsqrt(var + eps)
    else:
        # bf16-native elementwise path (v6e/v7x): no full fp32 working copy.
        xc = x - mean.astype(x.dtype)
        var = jnp.sum(xc * xc, axis=-1, keepdims=True, dtype=jnp.float32) * inv_hw
        y = xc * lax.rsqrt(var + jnp.float32(eps)).astype(x.dtype)
    o_ref[...] = y.astype(o_ref.dtype)


# ---------------------------------------------------------------------------
# Path B: HW-axis tiled (large spatial sizes). Two calls: stats, then apply.
# ---------------------------------------------------------------------------
def _instance_norm_stats_kernel(x_ref, mean_ref, inv_ref, s_ref, s2_ref, *,
                                eps, inv_hw, hw, hw_tile):
    k = pl.program_id(1)

    @pl.when(k == 0)
    def _():
        s_ref[...] = jnp.zeros_like(s_ref)
        s2_ref[...] = jnp.zeros_like(s2_ref)

    x = x_ref[...].astype(jnp.float32)
    if hw % hw_tile != 0:
        # Mask garbage lanes in the ragged last HW tile before accumulating.
        col = lax.broadcasted_iota(jnp.int32, x.shape, 1) + k * hw_tile
        x = jnp.where(col < hw, x, 0.0)
    s_ref[...] += jnp.sum(x, axis=-1, keepdims=True)
    s2_ref[...] += jnp.sum(x * x, axis=-1, keepdims=True)

    @pl.when(k == pl.num_programs(1) - 1)
    def _():
        # Single-pass variance in fp32 for the tiled path (x is not resident).
        mean = s_ref[...] * inv_hw
        var = jnp.maximum(s2_ref[...] * inv_hw - mean * mean, 0.0)
        mean_ref[...] = mean
        inv_ref[...] = lax.rsqrt(var + jnp.float32(eps))


def _instance_norm_apply_kernel(x_ref, mean_ref, inv_ref, o_ref, *, f32_elemwise):
    x = x_ref[...]
    mean = mean_ref[...]
    inv = inv_ref[...]
    if f32_elemwise:
        y = (x.astype(jnp.float32) - mean) * inv
    else:
        y = (x - mean.astype(x.dtype)) * inv.astype(x.dtype)
    o_ref[...] = y.astype(o_ref.dtype)


# ---------------------------------------------------------------------------
# Wrapper
# ---------------------------------------------------------------------------
def instance_norm(x, epsilon=1e-08, rows_per_block=None, hw_block=None):
    """x: (N, C, H, W) array (NCHW, matching the PyTorch module)."""
    N, C, H, W = x.shape
    NC, HW = N * C, H * W
    dtype = x.dtype
    itemsize = jnp.dtype(dtype).itemsize
    sublane = _sublane_multiple(dtype)

    vmem_cap, num_cores, kind = _chip_info()
    block_budget, vmem_limit = _budgets(vmem_cap)

    # bf16 elementwise math on bf16-native VPUs (v6e/v7x); fp32 path elsewhere
    # (v5e has no bf16 VALU) and for all other dtypes.
    f32_elemwise = (dtype != jnp.bfloat16) or ("v5" in kind)

    x2d = x.reshape(NC, HW)

    use_hw_tiling = hw_block is not None
    rows = None
    if not use_hw_tiling:
        rows = (rows_per_block if rows_per_block is not None
                else _pick_rows(NC, HW, itemsize, sublane, block_budget, num_cores))
        if rows is None:
            use_hw_tiling = True

    if not use_hw_tiling:
        # ---- Path A: one kernel, full HW per block, ragged last row block. ----
        grid = (pl.cdiv(NC, rows),)
        kernel = functools.partial(
            _instance_norm_block_kernel,
            eps=float(epsilon), inv_hw=1.0 / float(HW), f32_elemwise=f32_elemwise)
        out2d = pl.pallas_call(
            kernel,
            out_shape=jax.ShapeDtypeStruct((NC, HW), dtype),
            grid=grid,
            in_specs=[pl.BlockSpec((rows, HW), lambda i: (i, 0))],
            out_specs=pl.BlockSpec((rows, HW), lambda i: (i, 0)),
            compiler_params=pltpu.CompilerParams(
                dimension_semantics=("parallel",),
                vmem_limit_bytes=vmem_limit),
            cost_estimate=pl.CostEstimate(
                flops=7 * NC * HW,
                transcendentals=NC,
                bytes_accessed=2 * NC * HW * itemsize),
        )(x2d)
        return out2d.reshape(N, C, H, W)

    # ---- Path B: HW-tiled stats + normalize (large spatial sizes). ----
    rows_b, hw_tile = _pick_hw_tiling(
        NC, HW, itemsize, sublane, block_budget, num_cores, hw_block=hw_block)
    row_blocks = pl.cdiv(NC, rows_b)
    hw_blocks = pl.cdiv(HW, hw_tile)

    stats_kernel = functools.partial(
        _instance_norm_stats_kernel,
        eps=float(epsilon), inv_hw=1.0 / float(HW), hw=HW, hw_tile=hw_tile)
    mean, inv = pl.pallas_call(
        stats_kernel,
        out_shape=(jax.ShapeDtypeStruct((NC, 1), jnp.float32),
                   jax.ShapeDtypeStruct((NC, 1), jnp.float32)),
        grid=(row_blocks, hw_blocks),
        in_specs=[pl.BlockSpec((rows_b, hw_tile), lambda i, k: (i, k))],
        out_specs=(pl.BlockSpec((rows_b, 1), lambda i, k: (i, 0)),
                   pl.BlockSpec((rows_b, 1), lambda i, k: (i, 0))),
        scratch_shapes=[pltpu.VMEM((rows_b, 1), jnp.float32),
                        pltpu.VMEM((rows_b, 1), jnp.float32)],
        compiler_params=pltpu.CompilerParams(
            dimension_semantics=("parallel", "arbitrary"),
            vmem_limit_bytes=vmem_limit),
        cost_estimate=pl.CostEstimate(
            flops=3 * NC * HW,
            transcendentals=NC,
            bytes_accessed=NC * HW * itemsize),
    )(x2d)

    apply_kernel = functools.partial(
        _instance_norm_apply_kernel, f32_elemwise=f32_elemwise)
    out2d = pl.pallas_call(
        apply_kernel,
        out_shape=jax.ShapeDtypeStruct((NC, HW), dtype),
        grid=(row_blocks, hw_blocks),
        in_specs=[pl.BlockSpec((rows_b, hw_tile), lambda i, k: (i, k)),
                  pl.BlockSpec((rows_b, 1), lambda i, k: (i, 0)),
                  pl.BlockSpec((rows_b, 1), lambda i, k: (i, 0))],
        out_specs=pl.BlockSpec((rows_b, hw_tile), lambda i, k: (i, k)),
        compiler_params=pltpu.CompilerParams(
            dimension_semantics=("parallel", "parallel"),
            vmem_limit_bytes=vmem_limit),
        cost_estimate=pl.CostEstimate(
            flops=2 * NC * HW,
            transcendentals=0,
            bytes_accessed=2 * NC * HW * itemsize),
    )(x2d, mean, inv)
    return out2d.reshape(N, C, H, W)


def instance_norm_ref(x, epsilon=1e-08):
    xc = x - jnp.mean(x, axis=(2, 3), keepdims=True)
    return xc * lax.rsqrt(jnp.mean(xc * xc, axis=(2, 3), keepdims=True) + epsilon)


if __name__ == "__main__":
    # Path A (block fits in VMEM) at the module-typical small shape.
    x = jax.random.normal(jax.random.PRNGKey(0), (2, 4, 16, 16), dtype=jnp.float32)
    out = jax.block_until_ready(instance_norm(x))
    ref = instance_norm_ref(x)
    assert out.shape == (2, 4, 16, 16)
    assert jnp.allclose(out, ref, atol=1e-5, rtol=1e-5), "Path A mismatch vs reference"

    # Path B (HW-tiled) forced at a small shape that exercises both a ragged
    # last HW tile (324 = 2*128 + 68, lane masking) and a ragged row block.
    x2 = jax.random.normal(jax.random.PRNGKey(1), (3, 3, 18, 18), dtype=jnp.float32)
    x2 = x2 * 2.0 + 0.5
    out2 = jax.block_until_ready(instance_norm(x2, hw_block=128))
    ref2 = instance_norm_ref(x2)
    assert out2.shape == (3, 3, 18, 18)
    assert jnp.allclose(out2, ref2, atol=1e-4, rtol=1e-4), "Path B mismatch vs reference"

    print("KERNEL_OK")
</pallas_src>

<mosaic_0001>
module attributes {stable_mosaic.version = 11 : i64} {
  func.func @_instance_norm_block_kernel(%arg0: i32, %arg1: memref<8x256xf32, #tpu.memory_space<vmem>>, %arg2: memref<8x256xf32, #tpu.memory_space<vmem>>) attributes {dimension_semantics = [#tpu.dimension_semantics<parallel>], iteration_bounds = array<i64: 1>, scalar_prefetch = 0 : i64, scratch_operands = 0 : i64, tpu.core_type = #tpu.core_type<tc>, window_params = [{transform_indices = @transform_0, window_bounds = array<i64: 8, 256>}, {transform_indices = @transform_1, window_bounds = array<i64: 8, 256>}]} {
    %c0 = arith.constant 0 : index
    %c0_0 = arith.constant 0 : index
    %0 = vector.load %arg1[%c0, %c0_0] : memref<8x256xf32, #tpu.memory_space<vmem>>, vector<8x256xf32>
    %cst = arith.constant dense<0.000000e+00> : vector<8xf32>
    %1 = vector.multi_reduction <add>, %0, %cst [1] : vector<8x256xf32> to vector<8xf32>
    %2 = vector.shape_cast %1 : vector<8xf32> to vector<8x1xf32>
    %cst_1 = arith.constant 3.906250e-03 : f32
    %3 = vector.broadcast %cst_1 : f32 to vector<8x1xf32>
    %4 = arith.mulf %2, %3 : vector<8x1xf32>
    %5 = vector.broadcast %4 : vector<8x1xf32> to vector<8x256xf32>
    %6 = arith.subf %0, %5 : vector<8x256xf32>
    %7 = arith.mulf %6, %6 : vector<8x256xf32>
    %cst_2 = arith.constant dense<0.000000e+00> : vector<8xf32>
    %8 = vector.multi_reduction <add>, %7, %cst_2 [1] : vector<8x256xf32> to vector<8xf32>
    %9 = vector.shape_cast %8 : vector<8xf32> to vector<8x1xf32>
    %cst_3 = arith.constant 3.906250e-03 : f32
    %10 = vector.broadcast %cst_3 : f32 to vector<8x1xf32>
    %11 = arith.mulf %9, %10 : vector<8x1xf32>
    %cst_4 = arith.constant 9.99999993E-9 : f32
    %12 = vector.broadcast %cst_4 : f32 to vector<8x1xf32>
    %13 = arith.addf %11, %12 : vector<8x1xf32>
    %14 = math.rsqrt %13 : vector<8x1xf32>
    %15 = vector.broadcast %14 : vector<8x1xf32> to vector<8x256xf32>
    %16 = arith.mulf %6, %15 : vector<8x256xf32>
    %c0_5 = arith.constant 0 : index
    %c0_6 = arith.constant 0 : index
    %17 = vector.load %arg2[%c0_5, %c0_6] : memref<8x256xf32, #tpu.memory_space<vmem>>, vector<8x256xf32>
    tpu.vector_store %arg2[%c0_5, %c0_6], %16 {strides = array<i32>} : memref<8x256xf32, #tpu.memory_space<vmem>>, vector<8x256xf32>,
    return
  }
  func.func @transform_0(%arg0: i32) -> (i32, i32) {
    %c0_i32 = arith.constant 0 : i32
    %c0_i32_0 = arith.constant 0 : i32
    return %arg0, %c0_i32 : i32, i32
  }
  func.func @transform_1(%arg0: i32) -> (i32, i32) {
    %c0_i32 = arith.constant 0 : i32
    %c0_i32_0 = arith.constant 0 : i32
    return %arg0, %c0_i32 : i32, i32
  }
}

</mosaic_0001>

<bundles_post_ra>
// kernel: tpu_custom_call.1
= control target key start
LH: loop header
LB: loop body
LE: loop exit
PB: predicated region body
PF: predicated region fallthrough
CT: control target
= control target key end

     0   :  { %6 = vsyncpa [#allocation3], 0  ;;  %s122_s0 = inlined_call_operand.hbm [shape: f32[8,256], index: 0, kind: input, shape index: {}]   ;;  %s123_s1 = inlined_call_operand.hbm [shape: f32[8,256], index: 1, kind: output, shape index: {}]  }
   0x1   :  { %7 = vsyncpa [#allocation4], 0  ;;  %s104_s6 = smov [#allocation2]  }
   0x2   :  { %s14_s7 = sshll.u32 %s104_s6, 4  ;;  %s15_s7 = int_to_ptr.vmem [resolvable:$true] %s14_s7 }
   0x3   :  { %s68_s8 = scalar_lea.vmem %s15_s7, 256  ;;  %p73_p1 = scmp.lt.s32.totalorder %s15_s7, %s15_s7 }
   0x4   :  { %p69_p0 = scmp.ne.s32.totalorder %s15_s7, %s68_s8  ;;  %p74_p2 = scmp.lt.s32.totalorder %s68_s8, %s68_s8 }
   0x6   :  { %p75_p3 = por %p74_p2, %p73_p1 }
   0x8   :  { %p76_p4 = pnand %p75_p3, %p69_p0 }
   0xa   :  { %79 = shalt.err (!%p76_p4)
}
   0xb   :  { %17 = dma.hbm_to_vmem [thread:$0]  %s122_s0, 256, %s15_s7, [#allocation3]  }
   0xc   :  { %100 = dma.done.wait [#allocation3], 256  }
   0xd   :  { %101 = vsyncadd [#allocation3], 4294967040  ;;  %v21_v0 = vld [vmem:[#allocation2] sm:$0xff]  ;;  %v22_v1 = vld [vmem:[#allocation2 + $0x8] sm:$0xff]  ;;  %s105_s11 = smov [#allocation5]  }
   0xe   :  { %v23_v2 = vadd.f32 %v22_v1, %v21_v0  ;;  %s47_s0 = sshll.u32 %s105_s11, 4  ;;  %s48_s0 = int_to_ptr.vmem [resolvable:$true] %s47_s0 }
   0xf   :  { %s80_s12 = scalar_lea.vmem %s48_s0, 256  ;;  %p85_p6 = scmp.lt.s32.totalorder %s48_s0, %s48_s0 }
  0x10   :  { %24 = vadd.xlane.f32.xlu0 %v23_v2  ;;  %p81_p5 = scmp.ne.s32.totalorder %s48_s0, %s80_s12  ;;  %p86_p7 = scmp.lt.s32.totalorder %s80_s12, %s80_s12 }
  0x12   :  { %p87_p8 = por %p86_p7, %p85_p6 }
  0x14   :  { %p88_p9 = pnand %p87_p8, %p81_p5 }
  0x99   :  { %v25_v3 = vpop.xlane.xlu0 %24 }
  0x9a   :  { %v26_v4 = vmul.f32 0.00390625, %v25_v3 }
  0x9c   :  { %v27_v5 = vsub.f32 %v21_v0, %v26_v4  ;;  %v28_v6 = vsub.f32 %v22_v1, %v26_v4 }
  0x9e   :  { %v29_v7 = vmul.f32 %v27_v5, %v27_v5  ;;  %v30_v8 = vmul.f32 %v28_v6, %v28_v6 }
  0xa0   :  { %v31_v9 = vadd.f32 %v30_v8, %v29_v7 }
  0xa2   :  { %32 = vadd.xlane.f32.xlu0 %v31_v9 }
 0x12b   :  { %v33_v10 = vpop.xlane.xlu0 %32 }
 0x12c   :  { %v34_v11 = vmul.f32 0.00390625, %v33_v10 }
 0x12e   :  { %v35_v12 = vadd.f32 1e-08, %v34_v11 }
 0x130   :  { %58 = vrsqrt.f32 %v35_v12 }
 0x13d   :  { %v59_v13 = vpop.eup %58 }
 0x13e   :  { %v37_v14 = vmul.f32 %v59_v13, %v27_v5  ;;  %v38_v15 = vmul.f32 %v59_v13, %v28_v6 }
 0x140   :  { %39 = vst [vmem:[#allocation5] sm:$0xff] %v37_v14  ;;  %40 = vst [vmem:[#allocation5 + $0x8] sm:$0xff] %v38_v15 }
 0x141   :  { %91 = shalt.err (!%p88_p9)
}
 0x142   :  { %50 = dma.vmem_to_hbm [thread:$0]  %s48_s0, 256, %s123_s1, [#allocation4]  }
 0x143   :  { %102 = dma.done.wait [#allocation4], 256  }
 0x144   :  { %103 = vsyncadd [#allocation4], 4294967040 }
 0x145   :  { %54 = vsyncpa [#allocation3], 1 }
 0x146   :  { %55 = vsyncpa [#allocation4], 1 }

</bundles_post_ra>
